<compile_context>
chip_gen: v5e
topology: v5e:2x2
jax: 0.10.0
libtpu: 0.0.40
codegen_flags: <defaults>
</compile_context>

<pallas_src>
import functools

import jax
import jax.numpy as jnp
from jax import lax
from jax.experimental import pallas as pl
from jax.experimental.pallas import tpu as pltpu

_LANE = 128
_SUBLANE = 8


def _round_up(x, m):
    return (x + m - 1) // m * m


def _vmem_budget_bytes():
    """~3/4 of the per-core VMEM reported by the runtime (v7x-safe fallback)."""
    cap = None
    try:
        info = pltpu.get_tpu_info()
        cap = getattr(info, "vmem_capacity_bytes", None)
    except Exception:  # no TPU info available at trace time
        cap = None
    if not cap:
        cap = 64 * 1024 * 1024  # assume the smallest generation (v7x: 64 MiB/TC)
    return (int(cap) * 3) // 4


def _pick_tiles(B, nin, nout_pad, w_itemsize, budget):
    """Pick (tile_b, tile_n, vmem_limited) budgeting ALL resident buffers."""
    x_itemsize = 4

    # Batch tile: keep the full x block resident unless it would eat more than
    # ~1/4 of the budget; then tile B on sublane-aligned divisors.
    tile_b = B
    if B > _SUBLANE and B * nin * x_itemsize > budget // 4:
        divisors = [t for t in (1024, 512, 256, 128, 64, 32, 16, 8)
                    if t < B and B % t == 0]
        fitting = [t for t in divisors if t * nin * x_itemsize <= budget // 4]
        if fitting:
            tile_b = fitting[0]          # largest fitting divisor
        elif divisors:
            tile_b = divisors[-1]        # best effort

    # Class tile: largest 128-aligned tile <= 1024 whose resident set fits:
    #   2x weight tile (double-buffered) + 2x x block + 2x f32 output tile.
    def fits(tn):
        return (2 * tn * nin * w_itemsize
                + 2 * tile_b * nin * x_itemsize
                + 2 * tile_b * tn * 4) <= budget

    target = min(1024, nout_pad)
    tile_n = target
    while tile_n > _LANE and not fits(tile_n):
        tile_n -= _LANE
    vmem_limited = tile_n < target

    # Guarantee >= 2 class tiles so the "parallel" class axis shards across
    # v7x's two TensorCores (no effect on single-TC v5e/v6e).
    if nout_pad >= 2 * _LANE:
        tile_n = min(tile_n, max(_LANE, (nout_pad // 2) // _LANE * _LANE))

    return tile_b, tile_n, vmem_limited


def _dist_tile(x_ref, w_ref):
    # (tile_b, nin) . (tile_n, nin)^T -> (tile_b, tile_n), f32 MXU accumulation.
    # Weight may be stored bf16; the in-VMEM upcast is free under the HBM bound.
    return lax.dot_general(
        x_ref[...].astype(jnp.float32), w_ref[...].astype(jnp.float32),
        dimension_numbers=(((1,), (1,)), ((), ())),
        preferred_element_type=jnp.float32)


def _classifier_kernel_plain(x_ref, w_ref, out_ref):
    # margin=None path: plain logits, no one-hot / margin work at all.
    out_ref[...] = _dist_tile(x_ref, w_ref).astype(out_ref.dtype)


def _classifier_kernel_margin(x_ref, w_ref, y_ref, m_ref, out_ref, *, tile_n):
    dist = _dist_tile(x_ref, w_ref)
    # In-kernel one-hot (VPU slack is free here); the class iota is offset by
    # this class tile's global origin (class tiles live on grid axis 0).
    classes = (lax.broadcasted_iota(jnp.int32, dist.shape, 1)
               + pl.program_id(0) * tile_n)
    one_hot = (classes == y_ref[...]).astype(dist.dtype)
    # one_hot*(dist - margin) + (1 - one_hot)*dist == dist - one_hot*margin
    out_ref[...] = (dist - one_hot * m_ref[...]).astype(out_ref.dtype)


def pad_classifier_weight(weight, dtype=jnp.bfloat16):
    """One-time (init) weight prep: pad nout to a 128-lane multiple and store
    in bf16 so every forward streams half the bytes.  Padded rows are zeros, so
    the extra logits are exactly 0 and are sliced off by classifier_forward."""
    nout, nin = weight.shape
    nout_pad = _round_up(nout, _LANE)
    if nout_pad != nout:
        weight = jnp.pad(weight, ((0, nout_pad - nout), (0, 0)))
    return weight.astype(dtype)


@functools.partial(jax.jit, static_argnames=("nout",))
def classifier_forward(x, weight, y, margin=None, *, nout=None):
    """Classifier.forward.

    x:      (B, nin)       float32 features
    weight: (nout_pad, nin) classifier weight, nout_pad a multiple of 128
            (prepare once with pad_classifier_weight; bf16 recommended)
    y:      (B,)            integer labels
    margin: (B,)            float32 margins, or None
    nout:   true number of classes (<= nout_pad); defaults to weight.shape[0]
    """
    B, nin = x.shape
    nout_pad = weight.shape[0]
    if nout is None:
        nout = nout_pad
    assert nout_pad % _LANE == 0, "pad the weight once at init (pad_classifier_weight)"

    w_itemsize = jnp.dtype(weight.dtype).itemsize
    budget = _vmem_budget_bytes()
    tile_b, tile_n, vmem_limited = _pick_tiles(B, nin, nout_pad, w_itemsize, budget)

    nb = max(1, B // tile_b)                 # tile_b divides B (or equals it)
    nj = -(-nout_pad // tile_n)              # cdiv: ragged last class tile is OK

    # Class axis OUTERMOST so the weight is streamed from HBM exactly once even
    # when the batch is tiled (x re-reads are the cheap side for a classifier
    # head where nout * w_itemsize >> B * 4).
    grid = (nj, nb)

    x_spec = pl.BlockSpec((tile_b, nin), lambda j, i: (i, 0))
    if vmem_limited and tile_n <= 256 and nj >= 3:
        # Small streamed tiles expose DMA issue latency; a third buffer hides it.
        w_spec = pl.BlockSpec((tile_n, nin), lambda j, i: (j, 0),
                              pipeline_mode=pl.Buffered(3))
    else:
        w_spec = pl.BlockSpec((tile_n, nin), lambda j, i: (j, 0))
    vec_spec = pl.BlockSpec((tile_b, 1), lambda j, i: (i, 0))
    out_spec = pl.BlockSpec((tile_b, tile_n), lambda j, i: (i, j))
    out_shape = jax.ShapeDtypeStruct((B, nout_pad), jnp.float32)

    cost = pl.CostEstimate(
        flops=2 * B * nin * nout_pad,
        transcendentals=0,
        bytes_accessed=(nout_pad * nin * w_itemsize
                        + (nj if nb > 1 else 1) * B * nin * 4
                        + B * nout_pad * 4))
    cparams = pltpu.CompilerParams(
        dimension_semantics=("parallel", "parallel"),
        vmem_limit_bytes=budget)

    if margin is None:
        out = pl.pallas_call(
            _classifier_kernel_plain,
            out_shape=out_shape,
            grid=grid,
            in_specs=[x_spec, w_spec],
            out_specs=out_spec,
            compiler_params=cparams,
            cost_estimate=cost,
        )(x, weight)
    else:
        y2 = y.astype(jnp.int32).reshape(B, 1)
        m2 = margin.astype(jnp.float32).reshape(B, 1)
        out = pl.pallas_call(
            functools.partial(_classifier_kernel_margin, tile_n=tile_n),
            out_shape=out_shape,
            grid=grid,
            in_specs=[x_spec, w_spec, vec_spec, vec_spec],
            out_specs=out_spec,
            compiler_params=cparams,
            cost_estimate=cost,
        )(x, weight, y2, m2)

    # Cheap (B, nout) slice; the padded columns are exact zeros anyway.
    return out[:, :nout] if nout != nout_pad else out


def xavier_uniform(key, nout, nin):
    # torch.nn.init.xavier_uniform_ on a (nout, nin) parameter.
    bound = (6.0 / (nin + nout)) ** 0.5
    return jax.random.uniform(key, (nout, nin), jnp.float32, -bound, bound)


if __name__ == "__main__":
    def run_case(case_key, B, nin, nout):
        k_w, k_x, k_y, k_m = jax.random.split(case_key, 4)
        weight = xavier_uniform(k_w, nout, nin)
        x = jax.random.normal(k_x, (B, nin), jnp.float32)
        y = jax.random.randint(k_y, (B,), 0, nout)
        margin = jax.random.uniform(k_m, (B,), jnp.float32, 0.1, 0.5)

        # Init-time weight prep: pad to 128 lanes + bf16 storage (done once).
        w_store = pad_classifier_weight(weight)
        w_eff = w_store.astype(jnp.float32)[:nout]   # values the kernel multiplies by

        logit_plain = jax.block_until_ready(
            classifier_forward(x, w_store, y, None, nout=nout))
        logit_marg = jax.block_until_ready(
            classifier_forward(x, w_store, y, margin, nout=nout))

        # Reference: exactly the module's math, in plain f32.
        ref = (x[:, None, :] * w_eff[None, :, :]).sum(-1)
        one_hot = jax.nn.one_hot(y, nout, dtype=jnp.float32)
        ref_marg = ref - one_hot * margin[:, None]

        assert logit_plain.shape == (B, nout) and logit_marg.shape == (B, nout)
        assert jnp.allclose(logit_plain, ref, atol=2e-4, rtol=2e-4), \
            f"plain mismatch (B={B}, nin={nin}, nout={nout})"
        assert jnp.allclose(logit_marg, ref_marg, atol=2e-4, rtol=2e-4), \
            f"margin mismatch (B={B}, nin={nin}, nout={nout})"

    key = jax.random.PRNGKey(0)
    k1, k2, k3 = jax.random.split(key, 3)
    run_case(k1, B=8, nin=32, nout=16)     # tiny, single tile
    run_case(k2, B=16, nin=64, nout=300)   # unaligned nout: init-time pad + slice
    run_case(k3, B=16, nin=64, nout=600)   # ragged last class tile (cdiv grid)

    print("KERNEL_OK")
</pallas_src>

<mosaic_0001>
module attributes {stable_mosaic.version = 11 : i64} {
  func.func @_classifier_kernel_plain(%arg0: i32, %arg1: i32, %arg2: memref<8x32xf32, #tpu.memory_space<vmem>>, %arg3: memref<128x32xbf16, #tpu.memory_space<vmem>>, %arg4: memref<8x128xf32, #tpu.memory_space<vmem>>) attributes {dimension_semantics = [#tpu.dimension_semantics<parallel>, #tpu.dimension_semantics<parallel>], iteration_bounds = array<i64: 1, 1>, scalar_prefetch = 0 : i64, scratch_operands = 0 : i64, tpu.core_type = #tpu.core_type<tc>, window_params = [{transform_indices = @transform_0, window_bounds = array<i64: 8, 32>}, {transform_indices = @transform_1, window_bounds = array<i64: 128, 32>}, {transform_indices = @transform_2, window_bounds = array<i64: 8, 128>}]} {
    %c0 = arith.constant 0 : index
    %c0_0 = arith.constant 0 : index
    %0 = vector.load %arg2[%c0, %c0_0] : memref<8x32xf32, #tpu.memory_space<vmem>>, vector<8x32xf32>
    %c0_1 = arith.constant 0 : index
    %c0_2 = arith.constant 0 : index
    %1 = vector.load %arg3[%c0_1, %c0_2] : memref<128x32xbf16, #tpu.memory_space<vmem>>, vector<128x32xbf16>
    %2 = arith.extf %1 : vector<128x32xbf16> to vector<128x32xf32>
    %cst = arith.constant dense<0.000000e+00> : vector<8x128xf32>
    %3 = tpu.matmul %0, %2, %cst {dimension_numbers = #tpu.dot_dimension_numbers<[1], [1], [0], [0], [0, 0, 1, 0], [], []>} : vector<8x32xf32>, vector<128x32xf32>, vector<8x128xf32> -> vector<8x128xf32>
    %c0_3 = arith.constant 0 : index
    %c0_4 = arith.constant 0 : index
    %4 = vector.load %arg4[%c0_3, %c0_4] : memref<8x128xf32, #tpu.memory_space<vmem>>, vector<8x128xf32>
    tpu.vector_store %arg4[%c0_3, %c0_4], %3 {strides = array<i32>} : memref<8x128xf32, #tpu.memory_space<vmem>>, vector<8x128xf32>,
    return
  }
  func.func @transform_0(%arg0: i32, %arg1: i32) -> (i32, i32) {
    %c0_i32 = arith.constant 0 : i32
    %c0_i32_0 = arith.constant 0 : i32
    return %arg1, %c0_i32 : i32, i32
  }
  func.func @transform_1(%arg0: i32, %arg1: i32) -> (i32, i32) {
    %c0_i32 = arith.constant 0 : i32
    %c0_i32_0 = arith.constant 0 : i32
    return %arg0, %c0_i32 : i32, i32
  }
  func.func @transform_2(%arg0: i32, %arg1: i32) -> (i32, i32) {
    %c0_i32 = arith.constant 0 : i32
    return %arg1, %arg0 : i32, i32
  }
}

</mosaic_0001>

<bundles_post_ra>
// kernel: classifier_forward.1
= control target key start
LH: loop header
LB: loop body
LE: loop exit
PB: predicated region body
PF: predicated region fallthrough
CT: control target
= control target key end

     0   :  { %vm45_vm0 = vcmask 261120   ;;  %s280_s0 = inlined_call_operand.vmem [shape: f32[8,32], index: 0, kind: input, shape index: {}]   ;;  %s281_s1 = inlined_call_operand.vmem [shape: bf16[128,32], index: 1, kind: input, shape index: {}]   ;;  %s282_s2 = inlined_call_operand.hbm [shape: f32[8,128], index: 2, kind: output, shape index: {}]  }
   0x1   :  { %v189_v0 = vld [vmem:[%s281_s1 + $0x38] sm:$0xff]  }
   0x2   :  { %v182_v1 = vunpack.c.h.bf16 %v189_v0 }
   0x3   :  { %7 = vsyncpa [#allocation3], 0  ;;  %v181_v2 = vunpack.c.l.bf16 %v189_v0  ;;  %v188_v3 = vld [vmem:[%s281_s1 + $0x30] sm:$0xff]   ;;  %v187_v6 = vld [vmem:[%s281_s1 + $0x28] sm:$0xff]   ;;  %s217_s27 = smov [#allocation2]  }
   0x4   :  { %134 = vmatpush.xpose.msk.msra.mxu0 %vm45_vm0, %v182_v1  ;;  %v178_v4 = vunpack.c.h.bf16 %v188_v3  ;;  %v177_v5 = vunpack.c.l.bf16 %v188_v3  ;;  %v174_v7 = vunpack.c.h.bf16 %v187_v6  ;;  %v173_v8 = vunpack.c.l.bf16 %v187_v6  ;;  %v186_v9 = vld [vmem:[%s281_s1 + $0x20] sm:$0xff]   ;;  %v185_v12 = vld [vmem:[%s281_s1 + $0x18] sm:$0xff]   ;;  %v184_v15 = vld [vmem:[%s281_s1 + $0x10] sm:$0xff]   ;;  %s123_s28 = sshll.u32 %s217_s27, 4  ;;  %s124_s28 = int_to_ptr.vmem [resolvable:$true] %s123_s28 }
   0x5   :  { %v170_v10 = vunpack.c.h.bf16 %v186_v9  ;;  %v169_v11 = vunpack.c.l.bf16 %v186_v9  ;;  %v166_v13 = vunpack.c.h.bf16 %v185_v12  ;;  %v165_v14 = vunpack.c.l.bf16 %v185_v12  ;;  %v183_v18 = vld [vmem:[%s281_s1 + $0x8] sm:$0xff]   ;;  %v152_v21 = vld [vmem:[%s281_s1] sm:$0xff]   ;;  %s125_s1 = sshll.u32 %s282_s2, 4  ;;  %s126_s1 = int_to_ptr.hbm [resolvable:$true] %s125_s1 }
   0x6   :  { %v162_v16 = vunpack.c.h.bf16 %v184_v15  ;;  %v161_v17 = vunpack.c.l.bf16 %v184_v15  ;;  %v158_v19 = vunpack.c.h.bf16 %v183_v18  ;;  %v157_v20 = vunpack.c.l.bf16 %v183_v18  ;;  %v12_v24 = vld [vmem:[%s280_s0] sm:$0xff] }
   0x7   :  { %v154_v22 = vunpack.c.h.bf16 %v152_v21  ;;  %v153_v23 = vunpack.c.l.bf16 %v152_v21 }
   0x8   :  { %135 = vmatpush.xpose.msk.msra.mxu0 %vm45_vm0, %v181_v2 }
   0xc   :  { %136 = vmatpush.xpose.msk.msra.mxu0 %vm45_vm0, %v178_v4 }
  0x10   :  { %137 = vmatpush.xpose.msk.msra.mxu0 %vm45_vm0, %v177_v5 }
  0x14   :  { %138 = vmatpush.xpose.msk.msra.mxu0 %vm45_vm0, %v174_v7 }
  0x18   :  { %139 = vmatpush.xpose.msk.msra.mxu0 %vm45_vm0, %v173_v8 }
  0x1c   :  { %140 = vmatpush.xpose.msk.msra.mxu0 %vm45_vm0, %v170_v10 }
  0x20   :  { %141 = vmatpush.xpose.msk.msra.mxu0 %vm45_vm0, %v169_v11 }
  0x24   :  { %142 = vmatpush.xpose.msk.msra.mxu0 %vm45_vm0, %v166_v13 }
  0x28   :  { %143 = vmatpush.xpose.msk.msra.mxu0 %vm45_vm0, %v165_v14 }
  0x2c   :  { %144 = vmatpush.xpose.msk.msra.mxu0 %vm45_vm0, %v162_v16 }
  0x30   :  { %145 = vmatpush.xpose.msk.msra.mxu0 %vm45_vm0, %v161_v17 }
  0x34   :  { %146 = vmatpush.xpose.msk.msra.mxu0 %vm45_vm0, %v158_v19 }
  0x38   :  { %147 = vmatpush.xpose.msk.msra.mxu0 %vm45_vm0, %v157_v20 }
  0x3c   :  { %148 = vmatpush.xpose.msk.msra.mxu0 %vm45_vm0, %v154_v22 }
  0x40   :  { %149 = vmatpush.xpose.msk.msra.mxu0 %vm45_vm0, %v153_v23 }
  0x43   :  { %150 = vmatmul.msk.f32.vlgmr.msra.gmra.mxu0 %vm45_vm0, %v12_v24 }
  0xc0   :  { %v114_v25 = vpop.f32.mrf.mxu0 }
  0xc1   :  { %117 = vst [vmem:[#allocation2] sm:$0xff] %v114_v25 }
  0xc2   :  { %128 = dma.vmem_to_hbm [thread:$0]  %s124_s28, 128, %s126_s1, [#allocation3]  }
  0xc3   :  { %215 = dma.done.wait [#allocation3], 128  }
  0xc4   :  { %216 = vsyncadd [#allocation3], 4294967168 }
  0xc5   :  { %133 = vsyncpa [#allocation3], 1 }

</bundles_post_ra>
